<compile_context>
chip_gen: v6e
topology: v6e:2x2x1
jax: 0.10.0
libtpu: 0.0.40
codegen_flags: <defaults>
</compile_context>

<pallas_src>
import jax
import jax.numpy as jnp
from jax.experimental import pallas as pl
from jax.experimental.pallas import tpu as pltpu

_LANE = 1024                       # lane-dense last dim: large multiple of 128 -> unmasked vst
_SUBLANE = 8
_BLOCK_ELEMS = _LANE * _SUBLANE    # minimal (8, 1024) vreg-aligned block = 8192 elements
_MAX_TILE_BYTES = 8 * 1024 * 1024  # 8 MiB tile; 4x double-buffered footprint = 32 MiB
_MIN_GRID_STEPS = 2                # so v7x megacore sharding has work for both TCs
_PALLAS_MIN_ELEMS = 16384          # below this, plain fused XLA is strictly faster


def _round_up(a, b):
    return -(-a // b) * b


def _toy_kernel(params_ref, x_ref, o_ref):
    # params_ref: SMEM (4,) f32 -> [w1, b1, w2, b2]
    # x_ref / o_ref: VMEM (tile_rows, _LANE) tiles in the input's native dtype.
    w1 = params_ref[0]
    b1 = params_ref[1]
    w2 = params_ref[2]
    b2 = params_ref[3]

    x = x_ref[...].astype(jnp.float32)       # in-register upcast (free VPU slack)
    h = jnp.maximum(x * w1 + b1, 0.0)        # conv1 (1x1) + ReLU
    o_ref[...] = (h * w2 + b2).astype(o_ref.dtype)   # conv2 (1x1), store in native dtype


def _fused_reference(x, w1, b1, w2, b2):
    # Small-input fast path / numerical reference (same op order as the kernel).
    h = jnp.maximum(x.astype(jnp.float32) * w1 + b1, 0.0)
    return (h * w2 + b2).astype(x.dtype)


def toy_model_forward(x, w1, b1, w2, b2):
    """x: (N, 1, H, W). Returns (N, 1, H, W) with the same dtype as x."""
    orig_shape = x.shape
    assert x.ndim == 4 and x.shape[1] == 1, "ToyModel uses single-channel 1x1 convs"

    # Squeeze the Conv2d(1,1,1) parameters to scalars; compute in f32.
    w1, b1, w2, b2 = (jnp.asarray(p).reshape(()).astype(jnp.float32)
                      for p in (w1, b1, w2, b2))

    total = x.size
    if total < _PALLAS_MIN_ELEMS:
        # pallas_call launch + block padding dominates at this size; let XLA fuse it.
        return _fused_reference(x, w1, b1, w2, b2)

    itemsize = jnp.dtype(x.dtype).itemsize

    # Lane-dense 2D view in the NATIVE dtype. Reshape of a contiguous array is free;
    # only pad (one copy) when total is not already a multiple of 8*1024.
    flat = x.reshape(-1)
    pad = (-total) % _BLOCK_ELEMS
    if pad:
        flat = jnp.pad(flat, (0, pad))
    padded_total = total + pad
    rows = padded_total // _LANE               # multiple of 8
    x2d = flat.reshape(rows, _LANE)

    # Tile sizing: as big as possible (<= 8 MiB), multiple of 8 sublanes, but capped so
    # the grid has at least _MIN_GRID_STEPS steps (feeds both TCs on v7x).
    max_tile_rows = max(_SUBLANE, (_MAX_TILE_BYTES // (_LANE * itemsize)) // _SUBLANE * _SUBLANE)
    split_cap = max(_SUBLANE, _round_up(-(-rows // _MIN_GRID_STEPS), _SUBLANE))
    tile_rows = min(max_tile_rows, split_cap, rows)
    tile_rows = max(_SUBLANE, (tile_rows // _SUBLANE) * _SUBLANE)

    grid = (pl.cdiv(rows, tile_rows),)
    tile_bytes = tile_rows * _LANE * itemsize
    # 2 inputs-equivalents (in + out) x double buffering + headroom; safe on all gens.
    vmem_limit = int(min(48 * 1024 * 1024, 4 * tile_bytes + 8 * 1024 * 1024))

    params = jnp.stack([w1, b1, w2, b2])       # (4,) f32 in SMEM

    out2d = pl.pallas_call(
        _toy_kernel,
        out_shape=jax.ShapeDtypeStruct((rows, _LANE), x.dtype),
        grid=grid,
        in_specs=[
            pl.BlockSpec(memory_space=pltpu.SMEM),                 # scalar params
            pl.BlockSpec((tile_rows, _LANE), lambda i: (i, 0)),    # x row-tile
        ],
        out_specs=pl.BlockSpec((tile_rows, _LANE), lambda i: (i, 0)),
        compiler_params=pltpu.CompilerParams(
            dimension_semantics=("parallel",),                     # v7x 2-TC sharding
            vmem_limit_bytes=vmem_limit,
        ),
        cost_estimate=pl.CostEstimate(
            flops=5 * padded_total,
            transcendentals=0,
            bytes_accessed=2 * itemsize * padded_total,
        ),
    )(params, x2d)

    if pad:
        return out2d.reshape(-1)[:total].reshape(orig_shape)
    return out2d.reshape(orig_shape)           # free reshape, no extra HBM pass


if __name__ == "__main__":
    key = jax.random.PRNGKey(0)
    kx1, kx2, k1, k2, k3, k4 = jax.random.split(key, 6)

    # Conv2d(1,1,1) parameters => one scalar weight + one scalar bias per conv.
    w1 = jax.random.normal(k1, (), dtype=jnp.float32)
    b1 = jax.random.normal(k2, (), dtype=jnp.float32)
    w2 = jax.random.normal(k3, (), dtype=jnp.float32)
    b2 = jax.random.normal(k4, (), dtype=jnp.float32)

    # Tiny input (unit-test scale): takes the fused-XLA fast path.
    x_small = jax.random.normal(kx1, (2, 1, 16, 16), dtype=jnp.float32)
    out_small = jax.block_until_ready(toy_model_forward(x_small, w1, b1, w2, b2))
    ref_small = _fused_reference(x_small, w1, b1, w2, b2)
    assert out_small.shape == x_small.shape and out_small.dtype == x_small.dtype
    assert jnp.allclose(out_small, ref_small, atol=1e-6, rtol=1e-6)

    # Larger (still small) input: exercises the Pallas TPU kernel path
    # (2*1*128*128 = 32768 elements -> zero-pad-free (32, 1024) layout, grid=(2,)).
    x_big = jax.random.normal(kx2, (2, 1, 128, 128), dtype=jnp.float32)
    out_big = jax.block_until_ready(toy_model_forward(x_big, w1, b1, w2, b2))
    ref_big = _fused_reference(x_big, w1, b1, w2, b2)
    assert out_big.shape == x_big.shape and out_big.dtype == x_big.dtype
    assert jnp.allclose(out_big, ref_big, atol=1e-6, rtol=1e-6)

    print("KERNEL_OK")
</pallas_src>

<mosaic_0001>
module attributes {stable_mosaic.version = 11 : i64} {
  func.func @_toy_kernel(%arg0: i32, %arg1: memref<4xf32, #tpu.memory_space<smem>>, %arg2: memref<16x1024xf32, #tpu.memory_space<vmem>>, %arg3: memref<16x1024xf32, #tpu.memory_space<vmem>>) attributes {dimension_semantics = [#tpu.dimension_semantics<parallel>], iteration_bounds = array<i64: 2>, scalar_prefetch = 0 : i64, scratch_operands = 0 : i64, tpu.core_type = #tpu.core_type<tc>, window_params = [{transform_indices = @transform_0, window_bounds = array<i64: 4>}, {transform_indices = @transform_1, window_bounds = array<i64: 16, 1024>}, {transform_indices = @transform_2, window_bounds = array<i64: 16, 1024>}]} {
    %c0 = arith.constant 0 : index
    %0 = memref.load %arg1[%c0] : memref<4xf32, #tpu.memory_space<smem>>
    %c1 = arith.constant 1 : index
    %1 = memref.load %arg1[%c1] : memref<4xf32, #tpu.memory_space<smem>>
    %c2 = arith.constant 2 : index
    %2 = memref.load %arg1[%c2] : memref<4xf32, #tpu.memory_space<smem>>
    %c3 = arith.constant 3 : index
    %3 = memref.load %arg1[%c3] : memref<4xf32, #tpu.memory_space<smem>>
    %c0_0 = arith.constant 0 : index
    %c0_1 = arith.constant 0 : index
    %4 = vector.load %arg2[%c0_0, %c0_1] : memref<16x1024xf32, #tpu.memory_space<vmem>>, vector<16x1024xf32>
    %5 = vector.broadcast %0 : f32 to vector<16x1024xf32>
    %6 = arith.mulf %4, %5 : vector<16x1024xf32>
    %7 = vector.broadcast %1 : f32 to vector<16x1024xf32>
    %8 = arith.addf %6, %7 : vector<16x1024xf32>
    %cst = arith.constant 0.000000e+00 : f32
    %9 = vector.broadcast %cst : f32 to vector<16x1024xf32>
    %10 = arith.maximumf %8, %9 : vector<16x1024xf32>
    %11 = vector.broadcast %2 : f32 to vector<16x1024xf32>
    %12 = arith.mulf %10, %11 : vector<16x1024xf32>
    %13 = vector.broadcast %3 : f32 to vector<16x1024xf32>
    %14 = arith.addf %12, %13 : vector<16x1024xf32>
    %c0_2 = arith.constant 0 : index
    %c0_3 = arith.constant 0 : index
    %15 = vector.load %arg3[%c0_2, %c0_3] : memref<16x1024xf32, #tpu.memory_space<vmem>>, vector<16x1024xf32>
    tpu.vector_store %arg3[%c0_2, %c0_3], %14 {strides = array<i32>} : memref<16x1024xf32, #tpu.memory_space<vmem>>, vector<16x1024xf32>,
    return
  }
  func.func @transform_0(%arg0: i32) -> i32 {
    %c0_i32 = arith.constant 0 : i32
    %c0_i32_0 = arith.constant 0 : i32
    return %c0_i32 : i32
  }
  func.func @transform_1(%arg0: i32) -> (i32, i32) {
    %c0_i32 = arith.constant 0 : i32
    %c0_i32_0 = arith.constant 0 : i32
    return %arg0, %c0_i32 : i32, i32
  }
  func.func @transform_2(%arg0: i32) -> (i32, i32) {
    %c0_i32 = arith.constant 0 : i32
    %c0_i32_0 = arith.constant 0 : i32
    return %arg0, %c0_i32 : i32, i32
  }
}

</mosaic_0001>

<bundles_post_ra>
// kernel: tpu_custom_call.1
= control target key start
LH: loop header
LB: loop body
LE: loop exit
PB: predicated region body
PF: predicated region fallthrough
CT: control target
= control target key end

     0   :  { %7 = vsyncpa [#allocation5], 0  ;;  %s900_s0 = inlined_call_operand.hbm [shape: f32[4], index: 0, kind: input, shape index: {}]   ;;  %s901_s1 = inlined_call_operand.hbm [shape: f32[32,1024], index: 1, kind: input, shape index: {}]   ;;  %s902_s2 = inlined_call_operand.hbm [shape: f32[32,1024], index: 2, kind: output, shape index: {}]  }
   0x1   :  { %8 = vsyncpa [#allocation3], 0 }
   0x2   :  { %10 = vsyncpa [#allocation3 + $0x1], 0 }
   0x3   :  { %11 = vsyncpa [#allocation4], 0 }
   0x4   :  { %13 = vsyncpa [#allocation4 + $0x1], 0  ;;  %s614_s9 = smov 0   ;;  %s616_s10 = smov 0  }
   0x5   :  { %s618_s11 = smov 0   ;;  %s620_s12 = smov 0  }
   0x6 LB: > { %s635_s13 = sadd.s32 4294967295, %s590_s12   ;;  %s397_s14 = sadd.s32 4294967294, %s590_s12   ;;  %s590_s12 = sphi %s620_s12, %s924_s12   ;;  %s586_s11 = sphi %s618_s11, %s923_s11   ;;  %s582_s10 = sphi %s616_s10, %s922_s10   ;;  %s578_s9 = sphi %s614_s9, %s921_s9  }
   0x7   : > { %s639_s15 = sadd.s32 1, %s590_s12   ;;  %s47_s16 = sadd.s32 1, %s586_s11 }
   0x8   : > { %s44_s17 = ssub.s32 %s590_s12, %s639_s15  ;;  %p54_p0 = scmp.ne.s32.totalorder %s586_s11, %s582_s10 }
   0x9   : > { %p45_p1 = scmp.eq.s32.totalorder %s44_s17, 0  ;;  %p55_p2 = scmp.eq.s32.totalorder %s590_s12, 0 }
   0xa   : > { %p60_p3 = scmp.ne.s32.totalorder %s582_s10, %s578_s9  ;;  %p903_p4 = scmp.eq.s32.totalorder %s635_s13, 0 }
   0xb   : > { %s651_s18 = scalar_select %p45_p1, %s586_s11, %s47_s16  }
   0xc   : > { %p653_p5 = por %p55_p2, %p54_p0  ;;  %p659_p6 = por %p903_p4, %p60_p3 }
   0xd   : > { %p84_p7 = scmp.eq.s32.totalorder %s635_s13, 1  ;;  %p90_p8 = scmp.eq.s32.totalorder %s397_s14, 1 }
   0xe   : > { %s908_s20 = scalar_select %p659_p6, 1, 0 }
   0xf   : > { %p398_p9 = scmp.ge.s32.totalorder %s590_s12, 1  ;;  %p97_p10 = scmp.lt.s32.totalorder %s590_s12, 3 }
  0x10   : > { %p666_p11 = por %p84_p7, %p54_p0  ;;  %p670_p12 = por %p90_p8, %p60_p3 }
  0x11   : > { %p674_p13 = pnand %p398_p9, %p97_p10  ;;  %p443_p4 = scmp.lt.s32.totalorder %s590_s12, 2 }
  0x12   : > { %s909_s21 = scalar_select %p666_p11, 1, 0 }
  0x13   : > { %s910_s22 = scalar_select %p670_p12, 1, 0 }
  0x14   : > { %s911_s23 = scalar_select %p674_p13, 1, 0 }
  0x15   : > { %p430_p2 = pneg %p674_p13  ;;  %s119_s24 = sand.u32 1, %s586_s11  }
  0x16   : > { %s419_s25 = sshll.u32 %s590_s12, 11  ;;  %p912_p6 = scmp.eq.s32.totalorder %s635_s13, 0 }
  0x17   : > { %p688_p7 = pnand %p443_p4, %p653_p5  ;;  %s401_s27 = sshll.u32 %s119_s24, 7 }
  0x18   : > { %p431_p0 = pnand %p430_p2, %p912_p6  ;;  %s592_s28 = smov [#allocation2]  }
  0x19   : > { %s698_s5 = scalar_lea.hbm %s901_s1, %s419_s25  ;;  %s123_s6 = scalar_lea.vmem [#allocation6], %s401_s27 }
  0x1a   : > { %433 = dma.hbm_to_smem (!%p431_p0), %s900_s0, 16, %s592_s28, [#allocation5]  }
  0x1b   : > { %s131_s7 = sshll.u32 %s123_s6, 4  ;;  %s702_s8 = scalar_lea.sflag [#allocation3], %s119_s24  ;;  %s700_s7 = int_to_ptr.vmem [resolvable:$true] %s131_s7 }
  0x1c   : > { %s494_s14 = scalar_lea.hbm %s698_s5, 2048  ;;  %p496_p4 = pneg %p688_p7 }
  0x1d   : > { %p495_p3 = scmp.ne.s32.totalorder %s698_s5, %s494_s14  ;;  %s499_s19 = scalar_lea.hbm %s901_s1, 4096 }
  0x1e   : > { %p500_p8 = scmp.lt.s32.totalorder %s698_s5, %s901_s1  ;;  %p501_p9 = scmp.lt.s32.totalorder %s499_s19, %s494_s14 }
  0x1f   : > { %p497_p5 = pnand %p496_p4, %p495_p3 }
  0x20   : > { %p502_p10 = por %p501_p9, %p500_p8 }
  0x21   : > { %p498_p6 = pneg %p497_p5 }
  0x23   : > { %p503_p2 = pnand %p502_p10, %p498_p6 }
  0x25   : > { %506 = shalt.err (!%p503_p2)
}
  0x26   : > { %s507_s24 = scalar_lea.vmem %s700_s7, 2048  ;;  %s593_s27 = smov [#allocation6]  }
  0x27   : > { %p508_p0 = scmp.ne.s32.totalorder %s700_s7, %s507_s24  ;;  %s512_s29 = sshll.u32 %s593_s27, 4  ;;  %s513_s29 = int_to_ptr.vmem [resolvable:$false] %s512_s29 }
  0x28   : > { %s514_s30 = scalar_lea.vmem %s513_s29, 4096  ;;  %p515_p5 = scmp.lt.s32.totalorder %s700_s7, %s513_s29 }
  0x29   : > { %p510_p1 = pnand %p508_p0, %p496_p4  ;;  %p516_p12 = scmp.lt.s32.totalorder %s514_s30, %s507_s24 }
  0x2b   : > { %p511_p3 = pneg %p510_p1  ;;  %p517_p11 = por %p516_p12, %p515_p5 }
  0x2d   : > { %p518_p13 = pnand %p517_p11, %p511_p3 }
  0x2f   : > { %521 = shalt.err (!%p518_p13)
}
  0x30   : > { %s594_s3 = smov 1024   ;;  %s595_s4 = smov 64  }
  0x31   : > { %437 = dma.hbm_to_vmem [thread:$0]  (!%p688_p7), %s698_s5, 2048, %s700_s7, %s702_s8, %s594_s3, %s594_s3, %s595_s4  }
  0x32   : > { %p914_p4 = scmp.ne.s32.totalorder %s911_s23, 0 }
  0x33   : > { %p915_p1 = scmp.eq.s32.totalorder (!%p914_p4), %s635_s13, 0 }
  0x34   : > { %143 = sbr.rel (%p914_p4) target bundleno = 109 (0x6d), region = 28 }
  0x39   : > { %565 = dma.done.wait (%p915_p1), [#allocation5], 16   ;;  %p916_p6 = pmov %p915_p1 }
  0x3a   : > { %s730_s6 = sand.u32 1, %s582_s10   ;;  %p917_p11 = scmp.ne.s32.totalorder %s908_s20, 0 }
  0x3b   : > { %567 = vsyncadd (%p916_p6), [#allocation5], 4294967280  ;;  %s407_s14 = sshll.u32 %s730_s6, 7  ;;  %s150_s16 = scalar_lea.sflag [#allocation3], %s730_s6 }
  0x3c   : > { %s736_s26 = scalar_lea.vmem [#allocation6], %s407_s14 }
  0x3d   : > { %569 = dma.done.wait (%p917_p11), %s150_s16, 2048  }
  0x3e   : > { %571 = vsyncadd (%p917_p11), %s150_s16, 4294965248 }
  0x3f   : > { %158 = sfence }
  0x40   : > { %s177_s23 = sld [smem:[#allocation2]]  ;;  %v181_v0 = vld [vmem:[%s736_s26] sm:$0xff]  ;;  %v182_v1 = vld [vmem:[%s736_s26 + $0x8] sm:$0xff]  ;;  %v183_v2 = vld [vmem:[%s736_s26 + $0x10] sm:$0xff]  ;;  %s795_s20 = scalar_lea.vmem [#allocation7], %s407_s14 }
  0x41   : > { %s409_s5 = sld [smem:[#allocation2 + $0x1]]  ;;  %v184_v3 = vld [vmem:[%s736_s26 + $0x18] sm:$0xff]  ;;  %v185_v4 = vld [vmem:[%s736_s26 + $0x20] sm:$0xff]  ;;  %v186_v5 = vld [vmem:[%s736_s26 + $0x28] sm:$0xff]  ;;  %s421_s17 = sshll.u32 %s635_s13, 11 }
  0x42   : > { %s410_s7 = sld [smem:[#allocation2 + $0x2]]  ;;  %v187_v11 = vld [vmem:[%s736_s26 + $0x30] sm:$0xff]  ;;  %v188_v16 = vld [vmem:[%s736_s26 + $0x38] sm:$0xff]  ;;  %v189_v41 = vld [vmem:[%s736_s26 + $0x40] sm:$0xff]  ;;  %s312_s19 = sshll.u32 %s795_s20, 4  ;;  %s855_s19 = int_to_ptr.vmem [resolvable:$true] %s312_s19 }
  0x43   : > { %s411_s8 = sld [smem:[#allocation2 + $0x3]]  ;;  %v190_v42 = vld [vmem:[%s736_s26 + $0x48] sm:$0xff]  ;;  %v191_v43 = vld [vmem:[%s736_s26 + $0x50] sm:$0xff]  ;;  %v192_v48 = vld [vmem:[%s736_s26 + $0x58] sm:$0xff]  ;;  %s852_s28 = scalar_lea.hbm %s902_s2, %s421_s17 }
  0x44   : > { %v193_v49 = vld [vmem:[%s736_s26 + $0x60] sm:$0xff]  ;;  %v194_v50 = vld [vmem:[%s736_s26 + $0x68] sm:$0xff]  ;;  %v195_v59 = vld [vmem:[%s736_s26 + $0x70] sm:$0xff]  ;;  %s298_s24 = scalar_lea.sflag [#allocation4], %s730_s6  ;;  %s522_s27 = scalar_lea.vmem %s855_s19, 2048 }
  0x45   : > { %p523_p12 = scmp.ne.s32.totalorder %s855_s19, %s522_s27  ;;  %p918_p13 = scmp.ne.s32.totalorder %s909_s21, 0 }
  0x46   : > { %v748_v6 = vstv %s177_s23  ;;  %s596_s29 = smov [#allocation7]  }
  0x47   : > { %v198_v7 = vmul.f32 %v748_v6, %v181_v0  ;;  %v751_v8 = vstv %s409_s5  ;;  %v199_v9 = vmul.f32 %v748_v6, %v182_v1  ;;  %v200_v10 = vmul.f32 %v748_v6, %v183_v2  ;;  %v196_v0 = vld [vmem:[%s736_s26 + $0x78] sm:$0xff]  ;;  %p524_p7 = pnand %p523_p12, %p918_p13  ;;  %s526_s30 = sshll.u32 %s596_s29, 4  ;;  %s527_s30 = int_to_ptr.vmem [resolvable:$false] %s526_s30 }
  0x48   : > { %v756_v12 = vstv %s410_s7  ;;  %v201_v13 = vmul.f32 %v748_v6, %v184_v3  ;;  %v202_v14 = vmul.f32 %v748_v6, %v185_v4  ;;  %v203_v15 = vmul.f32 %v748_v6, %v186_v5  ;;  %s528_s3 = scalar_lea.vmem %s527_s30, 4096  ;;  %p529_p9 = scmp.lt.s32.totalorder %s855_s19, %s527_s30 }
  0x49   : > { %v215_v17 = vadd.f32 %v751_v8, %v198_v7  ;;  %v763_v18 = vstv %s411_s8  ;;  %v216_v19 = vadd.f32 %v751_v8, %v199_v9  ;;  %v217_v20 = vadd.f32 %v751_v8, %v200_v10  ;;  %p525_p8 = pneg %p524_p7  ;;  %p530_p10 = scmp.lt.s32.totalorder %s528_s3, %s522_s27 }
  0x4a   : > { %v218_v21 = vadd.f32 %v751_v8, %v201_v13  ;;  %v219_v22 = vadd.f32 %v751_v8, %v202_v14  ;;  %v220_v23 = vadd.f32 %v751_v8, %v203_v15  ;;  %v204_v24 = vmul.f32 %v748_v6, %v187_v11 }
  0x4b   : > { %v231_v25 = vmax.f32 %v215_v17, 0.0  ;;  %v232_v26 = vmax.f32 %v216_v19, 0.0  ;;  %v233_v27 = vmax.f32 %v217_v20, 0.0  ;;  %v205_v28 = vmul.f32 %v748_v6, %v188_v16  ;;  %p531_p2 = por %p530_p10, %p529_p9 }
  0x4c   : > { %v234_v29 = vmax.f32 %v218_v21, 0.0  ;;  %v235_v30 = vmax.f32 %v219_v22, 0.0  ;;  %v236_v31 = vmax.f32 %v220_v23, 0.0  ;;  %v221_v32 = vadd.f32 %v751_v8, %v204_v24 }
  0x4d   : > { %v248_v33 = vmul.f32 %v756_v12, %v231_v25  ;;  %v249_v34 = vmul.f32 %v756_v12, %v232_v26  ;;  %v250_v35 = vmul.f32 %v756_v12, %v233_v27  ;;  %v222_v36 = vadd.f32 %v751_v8, %v205_v28  ;;  %p532_p0 = pnand %p531_p2, %p525_p8 }
  0x4e   : > { %v251_v37 = vmul.f32 %v756_v12, %v234_v29  ;;  %v252_v38 = vmul.f32 %v756_v12, %v235_v30  ;;  %v253_v39 = vmul.f32 %v756_v12, %v236_v31  ;;  %v237_v40 = vmax.f32 %v221_v32, 0.0 }
  0x4f   : > { %v265_v44 = vadd.f32 %v763_v18, %v248_v33  ;;  %v266_v45 = vadd.f32 %v763_v18, %v249_v34  ;;  %v267_v46 = vadd.f32 %v763_v18, %v250_v35  ;;  %v238_v47 = vmax.f32 %v222_v36, 0.0 }
  0x50   : > { %v268_v51 = vadd.f32 %v763_v18, %v251_v37  ;;  %v269_v52 = vadd.f32 %v763_v18, %v252_v38  ;;  %v270_v53 = vadd.f32 %v763_v18, %v253_v39  ;;  %v254_v54 = vmul.f32 %v756_v12, %v237_v40 }
  0x51   : > { %281 = vst [vmem:[%s795_s20] sm:$0xff] %v265_v44  ;;  %282 = vst [vmem:[%s795_s20 + $0x8] sm:$0xff] %v266_v45  ;;  %v255_v55 = vmul.f32 %v756_v12, %v238_v47  ;;  %v206_v56 = vmul.f32 %v748_v6, %v189_v41  ;;  %v207_v57 = vmul.f32 %v748_v6, %v190_v42 }
  0x52   : > { %283 = vst [vmem:[%s795_s20 + $0x10] sm:$0xff] %v267_v46  ;;  %v208_v58 = vmul.f32 %v748_v6, %v191_v43  ;;  %284 = vst [vmem:[%s795_s20 + $0x18] sm:$0xff] %v268_v51  ;;  %v271_v60 = vadd.f32 %v763_v18, %v254_v54  ;;  %v209_v61 = vmul.f32 %v748_v6, %v192_v48 }
  0x53   : > { %285 = vst [vmem:[%s795_s20 + $0x20] sm:$0xff] %v269_v52  ;;  %286 = vst [vmem:[%s795_s20 + $0x28] sm:$0xff] %v270_v53  ;;  %v210_v62 = vmul.f32 %v748_v6, %v193_v49  ;;  %v211_v63 = vmul.f32 %v748_v6, %v194_v50  ;;  %v272_v1 = vadd.f32 %v763_v18, %v255_v55 }
  0x54   : > { %v223_v2 = vadd.f32 %v751_v8, %v206_v56  ;;  %v224_v3 = vadd.f32 %v751_v8, %v207_v57  ;;  %v225_v4 = vadd.f32 %v751_v8, %v208_v58  ;;  %287 = vst [vmem:[%s795_s20 + $0x30] sm:$0xff] %v271_v60  ;;  %v226_v5 = vadd.f32 %v751_v8, %v209_v61 }
  0x55   : > { %v227_v7 = vadd.f32 %v751_v8, %v210_v62  ;;  %v228_v9 = vadd.f32 %v751_v8, %v211_v63  ;;  %v212_v10 = vmul.f32 %v748_v6, %v195_v59  ;;  %288 = vst [vmem:[%s795_s20 + $0x38] sm:$0xff] %v272_v1  ;;  %v213_v15 = vmul.f32 %v748_v6, %v196_v0 }
  0x56   : > { %v239_v11 = vmax.f32 %v223_v2, 0.0  ;;  %v240_v13 = vmax.f32 %v224_v3, 0.0  ;;  %v241_v14 = vmax.f32 %v225_v4, 0.0  ;;  %v242_v16 = vmax.f32 %v226_v5, 0.0 }
  0x57   : > { %v243_v17 = vmax.f32 %v227_v7, 0.0  ;;  %v244_v19 = vmax.f32 %v228_v9, 0.0  ;;  %v229_v20 = vadd.f32 %v751_v8, %v212_v10  ;;  %v230_v24 = vadd.f32 %v751_v8, %v213_v15 }
  0x58   : > { %v256_v21 = vmul.f32 %v756_v12, %v239_v11  ;;  %v257_v22 = vmul.f32 %v756_v12, %v240_v13  ;;  %v258_v23 = vmul.f32 %v756_v12, %v241_v14  ;;  %v259_v25 = vmul.f32 %v756_v12, %v242_v16 }
  0x59   : > { %v260_v6 = vmul.f32 %v756_v12, %v243_v17  ;;  %v261_v26 = vmul.f32 %v756_v12, %v244_v19  ;;  %v245_v27 = vmax.f32 %v229_v20, 0.0  ;;  %v246_v31 = vmax.f32 %v230_v24, 0.0 }
  0x5a   : > { %v273_v28 = vadd.f32 %v763_v18, %v256_v21  ;;  %v274_v29 = vadd.f32 %v763_v18, %v257_v22  ;;  %v275_v30 = vadd.f32 %v763_v18, %v258_v23  ;;  %v276_v8 = vadd.f32 %v763_v18, %v259_v25 }
  0x5b   : > { %v277_v32 = vadd.f32 %v763_v18, %v260_v6  ;;  %v278_v33 = vadd.f32 %v763_v18, %v261_v26  ;;  %v262_v34 = vmul.f32 %v756_v12, %v245_v27  ;;  %v263_v35 = vmul.f32 %v756_v12, %v246_v31 }
  0x5c   : > { %289 = vst [vmem:[%s795_s20 + $0x40] sm:$0xff] %v273_v28  ;;  %290 = vst [vmem:[%s795_s20 + $0x48] sm:$0xff] %v274_v29 }
  0x5d   : > { %291 = vst [vmem:[%s795_s20 + $0x50] sm:$0xff] %v275_v30  ;;  %292 = vst [vmem:[%s795_s20 + $0x58] sm:$0xff] %v276_v8  ;;  %v279_v36 = vadd.f32 %v763_v18, %v262_v34  ;;  %v280_v37 = vadd.f32 %v763_v18, %v263_v35 }
  0x5e   : > { %293 = vst [vmem:[%s795_s20 + $0x60] sm:$0xff] %v277_v32  ;;  %294 = vst [vmem:[%s795_s20 + $0x68] sm:$0xff] %v278_v33 }
  0x5f   : > { %295 = vst [vmem:[%s795_s20 + $0x70] sm:$0xff] %v279_v36  ;;  %296 = vst [vmem:[%s795_s20 + $0x78] sm:$0xff] %v280_v37 }
  0x60   : > { %535 = shalt.err (!%p532_p0)
}
  0x61   : > { %s536_s4 = scalar_lea.hbm %s852_s28, 2048  ;;  %s540_s26 = scalar_lea.hbm %s902_s2, 4096 }
  0x62   : > { %p537_p3 = scmp.ne.s32.totalorder %s852_s28, %s536_s4  ;;  %p541_p1 = scmp.lt.s32.totalorder %s852_s28, %s902_s2 }
  0x63   : > { %p542_p6 = scmp.lt.s32.totalorder %s540_s26, %s536_s4 }
  0x64   : > { %p538_p5 = pnand %p537_p3, %p918_p13 }
  0x65   : > { %p543_p11 = por %p542_p6, %p541_p1 }
  0x66   : > { %p539_p4 = pneg %p538_p5 }
  0x68   : > { %p544_p12 = pnand %p543_p11, %p539_p4 }
  0x6a   : > { %547 = shalt.err (!%p544_p12)
}
  0x6b   : > { %s597_s7 = smov 1024   ;;  %s598_s8 = smov 64  }
  0x6c   : > { %428 = dma.vmem_to_hbm [thread:$0]  (%p918_p13), %s855_s19, 2048, %s852_s28, %s298_s24, %s597_s7, %s597_s7, %s598_s8  }
  0x6d PF: > { %s327_s20 = sand.u32 1, %s578_s9   ;;  %p919_p7 = scmp.ne.s32.totalorder %s910_s22, 0 }
  0x6e   : > { %p920_p8 = scmp.ge.s32.totalorder %s590_s12, 2  ;;  %s328_s17 = scalar_lea.sflag [#allocation4], %s327_s20 }
  0x70   : > { %p439_p9 = pnand %p920_p8, %p919_p7 }
  0x72   : > { %p440_p10 = pneg %p439_p9 }
  0x74   : > { %573 = dma.done.wait (%p440_p10), %s328_s17, 2048  }
  0x75   : > { %575 = vsyncadd (%p440_p10), %s328_s17, 4294965248  ;;  %p16_p2 = scmp.ge.s32.totalorder %s639_s15, 4   ;;  %s921_s9 = smov %s582_s10 }
  0x76   : > { %s922_s10 = smov %s586_s11  ;;  %s923_s11 = smov %s651_s18 }
  0x77   : > { %s924_s12 = smov %s639_s15  ;;  %18 = sbr.rel (!%p16_p2) target bundleno = 6 (0x6), region = 78 }
  0x7c   :  { %333 = vsyncpa [#allocation3], 1 }
  0x7d   :  { %335 = vsyncpa [#allocation3 + $0x1], 1 }
  0x7e   :  { %336 = vsyncpa [#allocation4], 1 }
  0x7f   :  { %338 = vsyncpa [#allocation4 + $0x1], 1 }
  0x80   :  { %339 = vsyncpa [#allocation5], 1 }
  0x81   :  { %341 = vsyncpa [#allocation5 + $0x1], 1 }

</bundles_post_ra>
